<compile_context>
chip_gen: v5e
topology: v5e:2x2
jax: 0.10.0
libtpu: 0.0.40
codegen_flags: <defaults>
</compile_context>

<pallas_src>
import functools

import jax
import jax.numpy as jnp
from jax.experimental import pallas as pl
from jax.experimental.pallas import tpu as pltpu

VARIANCE_EPS = 1e-12


def _layernorm_kernel(x_ref, gamma_ref, beta_ref, o_ref, *, hidden):
    """One (row_tile, Hp) block; normalize each row over the real `hidden` lanes."""
    x = x_ref[...].astype(jnp.float32)                   # (tr, Hp)
    hp = x.shape[-1]
    inv_h = jnp.float32(1.0 / hidden)

    # Padded lanes (if any) are zero-filled by the wrapper, so a plain sum
    # divided by the real H gives the correct mean without masking.
    mu = jnp.sum(x, axis=-1, keepdims=True) * inv_h       # (tr, 1)
    xc = x - mu
    if hp != hidden:
        # Zero the pad lanes of the centered values so they don't leak mu^2
        # into the variance.
        lane = jax.lax.broadcasted_iota(jnp.int32, (1, hp), 1)
        xc = jnp.where(lane < hidden, xc, 0.0)
    var = jnp.sum(xc * xc, axis=-1, keepdims=True) * inv_h  # biased variance
    inv = jax.lax.rsqrt(var + VARIANCE_EPS)

    if o_ref.dtype == jnp.float32:
        gamma = gamma_ref[...].astype(jnp.float32)          # (1, Hp) resident
        beta = beta_ref[...].astype(jnp.float32)
        o_ref[...] = gamma * (xc * inv) + beta
    else:
        # Low-precision output (e.g. bf16): do the final scale/shift in the
        # packed output dtype (2 elem/lane) to keep v7x on the HBM roofline
        # instead of becoming VALU-bound. Neutral on v6e, harmless on v5e.
        xn = (xc * inv).astype(o_ref.dtype)
        gamma = gamma_ref[...].astype(o_ref.dtype)
        beta = beta_ref[...].astype(o_ref.dtype)
        o_ref[...] = gamma * xn + beta


def _choose_row_tile(num_rows, hidden_padded, dtype):
    """Largest safe row tile: VMEM-aware (incl. f32 upcast temps), >= ~1 MiB
    of input I/O per block, at most ~4 blocks worth of splitting."""
    itemsize = jnp.dtype(dtype).itemsize
    # Native sublane packing: 8 rows f32, 16 bf16, 32 int8/fp8.
    pack = max(8, 32 // itemsize)

    # VMEM bytes per block row: double-buffered input + output tiles plus
    # ~4 full-width f32 intermediates materialized inside the body.
    bytes_per_row = hidden_padded * (4 * itemsize + 4 * 4)
    vmem_budget = 32 * 1024 * 1024            # stays well under the 48 MiB limit (v7x-safe)
    max_rows_vmem = max(pack, vmem_budget // bytes_per_row)

    # Only shrink the tile to get ~4 pipeline blocks, and never below ~1 MiB
    # of input bytes per block.
    min_rows_1mib = max(pack, (1024 * 1024) // max(1, hidden_padded * itemsize))
    want = max(min_rows_1mib, pl.cdiv(num_rows, 4))
    tile = min(max_rows_vmem, want)

    # Never bigger than the (pack-rounded) problem itself.
    rows_rounded = ((num_rows + pack - 1) // pack) * pack
    tile = min(tile, rows_rounded)

    # Round down to the sublane packing (never below one packed group).
    tile = max(pack, (tile // pack) * pack)
    return int(tile)


def bert_layer_norm(x, gamma, beta, *, row_tile=None):
    """x: [..., H]; gamma, beta: [H]. Returns same shape/dtype as x."""
    orig_shape = x.shape
    H = orig_shape[-1]
    x2 = x.reshape(-1, H)
    R = x2.shape[0]

    # Lane-dense layout: pad hidden to a multiple of 128 so loads/stores are
    # full-lane. gamma/beta are zero-padded so pad lanes of the output are
    # exactly zero and are simply sliced off afterwards.
    Hp = ((H + 127) // 128) * 128
    if Hp != H:
        x2 = jnp.pad(x2, ((0, 0), (0, Hp - H)))
        gamma2 = jnp.pad(gamma.reshape(-1), (0, Hp - H)).reshape(1, Hp)
        beta2 = jnp.pad(beta.reshape(-1), (0, Hp - H)).reshape(1, Hp)
    else:
        gamma2 = gamma.reshape(1, H)
        beta2 = beta.reshape(1, H)

    if row_tile is None:
        row_tile = _choose_row_tile(R, Hp, x2.dtype)
    else:
        # Keep user-provided tiles aligned to the dtype's sublane packing.
        pack = max(8, 32 // jnp.dtype(x2.dtype).itemsize)
        row_tile = max(pack, (int(row_tile) // pack) * pack)

    grid = (pl.cdiv(R, row_tile),)   # partial last block is masked by Pallas

    kernel = functools.partial(_layernorm_kernel, hidden=H)
    out = pl.pallas_call(
        kernel,
        out_shape=jax.ShapeDtypeStruct((R, Hp), x.dtype),
        grid_spec=pltpu.PrefetchScalarGridSpec(
            num_scalar_prefetch=0,
            grid=grid,
            in_specs=[
                pl.BlockSpec((row_tile, Hp), lambda i: (i, 0)),
                pl.BlockSpec((1, Hp), lambda i: (0, 0)),   # gamma: VMEM-resident
                pl.BlockSpec((1, Hp), lambda i: (0, 0)),   # beta:  VMEM-resident
            ],
            out_specs=pl.BlockSpec((row_tile, Hp), lambda i: (i, 0)),
        ),
        compiler_params=pltpu.CompilerParams(
            # NOTE: on v7x, pltpu.CORE_PARALLEL on this axis could shard rows
            # across both TensorCores; plain "parallel" is kept for portability.
            dimension_semantics=("parallel",),
            vmem_limit_bytes=48 * 1024 * 1024,  # safe on v5e/v6e/v7x
        ),
    )(x2, gamma2, beta2)

    if Hp != H:
        out = out[:, :H]
    return out.reshape(orig_shape)


if __name__ == "__main__":
    key = jax.random.PRNGKey(0)
    batch, seq, hidden = 2, 8, 32
    x = jax.random.normal(key, (batch, seq, hidden), dtype=jnp.float32)

    # deterministic parameter init (matches nn.Parameter(ones/zeros))
    gamma = jnp.ones((hidden,), dtype=jnp.float32)
    beta = jnp.zeros((hidden,), dtype=jnp.float32)

    out = bert_layer_norm(x, gamma, beta)
    out = jax.block_until_ready(out)

    # reference check in plain JAX
    mu = jnp.mean(x, axis=-1, keepdims=True)
    var = jnp.mean((x - mu) ** 2, axis=-1, keepdims=True)
    ref = gamma * ((x - mu) / jnp.sqrt(var + VARIANCE_EPS)) + beta
    assert out.shape == x.shape and out.dtype == x.dtype
    assert jnp.allclose(out, ref, atol=1e-5, rtol=1e-5)

    print("KERNEL_OK")
</pallas_src>

<mosaic_0001>
module attributes {stable_mosaic.version = 11 : i64} {
  func.func @_layernorm_kernel(%arg0: i32, %arg1: memref<16x128xf32, #tpu.memory_space<vmem>>, %arg2: memref<1x128xf32, #tpu.memory_space<vmem>>, %arg3: memref<1x128xf32, #tpu.memory_space<vmem>>, %arg4: memref<16x128xf32, #tpu.memory_space<vmem>>) attributes {dimension_semantics = [#tpu.dimension_semantics<parallel>], iteration_bounds = array<i64: 1>, scalar_prefetch = 0 : i64, scratch_operands = 0 : i64, tpu.core_type = #tpu.core_type<tc>, window_params = [{transform_indices = @transform_0, window_bounds = array<i64: 16, 128>}, {pipeline_mode = #tpu.pipeline_mode<synchronous>, transform_indices = @transform_1, window_bounds = array<i64: 1, 128>}, {pipeline_mode = #tpu.pipeline_mode<synchronous>, transform_indices = @transform_2, window_bounds = array<i64: 1, 128>}, {transform_indices = @transform_3, window_bounds = array<i64: 16, 128>}]} {
    %c0 = arith.constant 0 : index
    %c0_0 = arith.constant 0 : index
    %0 = vector.load %arg1[%c0, %c0_0] : memref<16x128xf32, #tpu.memory_space<vmem>>, vector<16x128xf32>
    %cst = arith.constant dense<0.000000e+00> : vector<16xf32>
    %1 = vector.multi_reduction <add>, %0, %cst [1] : vector<16x128xf32> to vector<16xf32>
    %2 = vector.shape_cast %1 : vector<16xf32> to vector<16x1xf32>
    %cst_1 = arith.constant 3.125000e-02 : f32
    %3 = vector.broadcast %cst_1 : f32 to vector<16x1xf32>
    %4 = arith.mulf %2, %3 : vector<16x1xf32>
    %5 = vector.broadcast %4 : vector<16x1xf32> to vector<16x128xf32>
    %6 = arith.subf %0, %5 : vector<16x128xf32>
    %7 = tpu.iota {dimensions = array<i32: 1>} : vector<1x128xi32>
    %c32_i32 = arith.constant 32 : i32
    %8 = vector.broadcast %c32_i32 : i32 to vector<1x128xi32>
    %9 = arith.cmpi slt, %7, %8 : vector<1x128xi32>
    %cst_2 = arith.constant 0.000000e+00 : f32
    %10 = vector.shape_cast %9 : vector<1x128xi1> to vector<1x128xi1>
    %11 = vector.broadcast %10 : vector<1x128xi1> to vector<16x128xi1>
    %12 = vector.broadcast %cst_2 : f32 to vector<16x128xf32>
    %13 = arith.select %11, %6, %12 : vector<16x128xi1>, vector<16x128xf32>
    %14 = arith.mulf %13, %13 : vector<16x128xf32>
    %cst_3 = arith.constant dense<0.000000e+00> : vector<16xf32>
    %15 = vector.multi_reduction <add>, %14, %cst_3 [1] : vector<16x128xf32> to vector<16xf32>
    %16 = vector.shape_cast %15 : vector<16xf32> to vector<16x1xf32>
    %cst_4 = arith.constant 3.125000e-02 : f32
    %17 = vector.broadcast %cst_4 : f32 to vector<16x1xf32>
    %18 = arith.mulf %16, %17 : vector<16x1xf32>
    %cst_5 = arith.constant 9.99999996E-13 : f32
    %19 = vector.broadcast %cst_5 : f32 to vector<16x1xf32>
    %20 = arith.addf %18, %19 : vector<16x1xf32>
    %21 = math.rsqrt %20 : vector<16x1xf32>
    %c0_6 = arith.constant 0 : index
    %c0_7 = arith.constant 0 : index
    %22 = vector.load %arg2[%c0_6, %c0_7] : memref<1x128xf32, #tpu.memory_space<vmem>>, vector<1x128xf32>
    %c0_8 = arith.constant 0 : index
    %c0_9 = arith.constant 0 : index
    %23 = vector.load %arg3[%c0_8, %c0_9] : memref<1x128xf32, #tpu.memory_space<vmem>>, vector<1x128xf32>
    %24 = vector.broadcast %21 : vector<16x1xf32> to vector<16x128xf32>
    %25 = arith.mulf %13, %24 : vector<16x128xf32>
    %26 = vector.broadcast %22 : vector<1x128xf32> to vector<16x128xf32>
    %27 = arith.mulf %26, %25 : vector<16x128xf32>
    %28 = vector.broadcast %23 : vector<1x128xf32> to vector<16x128xf32>
    %29 = arith.addf %27, %28 : vector<16x128xf32>
    %c0_10 = arith.constant 0 : index
    %c0_11 = arith.constant 0 : index
    %30 = vector.load %arg4[%c0_10, %c0_11] : memref<16x128xf32, #tpu.memory_space<vmem>>, vector<16x128xf32>
    tpu.vector_store %arg4[%c0_10, %c0_11], %29 {strides = array<i32>} : memref<16x128xf32, #tpu.memory_space<vmem>>, vector<16x128xf32>,
    return
  }
  func.func @transform_0(%arg0: i32) -> (i32, i32) {
    %c0_i32 = arith.constant 0 : i32
    %c0_i32_0 = arith.constant 0 : i32
    return %arg0, %c0_i32 : i32, i32
  }
  func.func @transform_1(%arg0: i32) -> (i32, i32) {
    %c0_i32 = arith.constant 0 : i32
    %c0_i32_0 = arith.constant 0 : i32
    %c0_i32_1 = arith.constant 0 : i32
    return %c0_i32, %c0_i32_0 : i32, i32
  }
  func.func @transform_2(%arg0: i32) -> (i32, i32) {
    %c0_i32 = arith.constant 0 : i32
    %c0_i32_0 = arith.constant 0 : i32
    %c0_i32_1 = arith.constant 0 : i32
    return %c0_i32, %c0_i32_0 : i32, i32
  }
  func.func @transform_3(%arg0: i32) -> (i32, i32) {
    %c0_i32 = arith.constant 0 : i32
    %c0_i32_0 = arith.constant 0 : i32
    return %arg0, %c0_i32 : i32, i32
  }
}

</mosaic_0001>

<bundles_post_ra>
// kernel: tpu_custom_call.1
= control target key start
LH: loop header
LB: loop body
LE: loop exit
PB: predicated region body
PF: predicated region fallthrough
CT: control target
= control target key end

     0   :  { %8 = vsyncpa [#allocation3], 0  ;;  %s260_s0 = inlined_call_operand.hbm [shape: f32[16,128], index: 0, kind: input, shape index: {}]   ;;  %s261_s1 = inlined_call_operand.hbm [shape: f32[1,128], index: 1, kind: input, shape index: {}]   ;;  %s262_s2 = inlined_call_operand.vmem [shape: f32[1,128], index: 2, kind: input, shape index: {}]   ;;  %s263_s3 = inlined_call_operand.hbm [shape: f32[16,128], index: 3, kind: output, shape index: {}]  }
   0x1   :  { %9 = vsyncpa [#allocation6], 0 }
   0x2   :  { %10 = vsyncpa [#allocation4], 0  ;;  %s15_s14 = sshll.u32 %s260_s0, 4  ;;  %s217_s15 = smov [#allocation2]   ;;  %s16_s14 = int_to_ptr.hbm [resolvable:$true] %s15_s14 }
   0x3   :  { %s17_s16 = sshll.u32 %s217_s15, 4  ;;  %s29_s19 = sshll.u32 %s261_s1, 4  ;;  %s18_s16 = int_to_ptr.vmem [resolvable:$true] %s17_s16  ;;  %s30_s19 = int_to_ptr.hbm [resolvable:$true] %s29_s19 }
   0x4   :  { %s218_s20 = smov 128   ;;  %s219_s21 = smov 8  }
   0x5   :  { %23 = dma.hbm_to_vmem [thread:$0]  %s16_s14, 256, %s18_s16, [#allocation3], %s218_s20, %s218_s20, %s219_s21  }
   0x6   :  { %s220_s22 = smov [#allocation5]  }
   0x7   :  { %s31_s23 = sshll.u32 %s220_s22, 4  ;;  %s32_s23 = int_to_ptr.vmem [resolvable:$true] %s31_s23 }
   0x8   :  { %34 = dma.hbm_to_vmem [thread:$0]  %s30_s19, 16, %s32_s23, [#allocation6]  }
   0x9   :  { %211 = dma.done.wait [#allocation3], 256  }
   0xa   :  { %212 = vsyncadd [#allocation3], 4294967040 }
   0xb   :  { %213 = dma.done.wait [#allocation6], 16  }
   0xc   :  { %214 = vsyncadd [#allocation6], 4294967280  ;;  %v45_v0 = vld [vmem:[#allocation2] sm:$0xff]  ;;  %v46_v1 = vld [vmem:[#allocation2 + $0x8] sm:$0xff]  ;;  %v55_v2 = vlaneseq  ;;  %s221_s24 = smov [#allocation7]   ;;  %s114_s28 = sshll.u32 %s263_s3, 4  ;;  %s115_s28 = int_to_ptr.hbm [resolvable:$true] %s114_s28 }
   0xd   :  { %47 = vadd.xlane.f32.xlu0 %v45_v0  ;;  %v133_v28 = vld [vmem:[#allocation5] ss:$0 sm:$0xff]  ;;  %v134_v32 = vld [vmem:[%s262_s2] ss:$0 sm:$0xff]  ;;  %s112_s25 = sshll.u32 %s221_s24, 4  ;;  %s113_s25 = int_to_ptr.vmem [resolvable:$true] %s112_s25 }
   0xe   :  { %v56_v3 = vand.u32 127, %v55_v2 }
  0x10   :  { %vm57_vm0 = vcmp.lt.s32.totalorder %v56_v3, 32 }
  0x15   :  { %49 = vadd.xlane.f32.xlu0 %v46_v1 }
  0x80   :  { %v48_v4 = vpop.xlane.xlu0 %47 }
  0x81   :  { %v51_v5 = vmul.f32 0.03125, %v48_v4 }
  0x83   :  { %v53_v6 = vsub.f32 %v45_v0, %v51_v5 }
  0x85   :  { %v60_v7 = vsel %vm57_vm0, %v53_v6, 0.0 }
  0x86   :  { %v62_v8 = vmul.f32 %v60_v7, %v60_v7 }
  0x88   :  { %64 = vadd.xlane.f32.xlu1 %v62_v8  ;;  %v50_v9 = vpop.xlane.xlu0 %49 }
  0x89   :  { %v52_v10 = vmul.f32 0.03125, %v50_v9 }
  0x8b   :  { %v54_v11 = vsub.f32 %v46_v1, %v52_v10 }
  0x8d   :  { %v61_v12 = vsel %vm57_vm0, %v54_v11, 0.0 }
  0x8e   :  { %v63_v13 = vmul.f32 %v61_v12, %v61_v12 }
  0x90   :  { %66 = vadd.xlane.f32.xlu1 %v63_v13 }
  0xfb   :  { %v65_v14 = vpop.xlane.xlu1 %64 }
  0xfc   :  { %v68_v15 = vmul.f32 0.03125, %v65_v14 }
  0xfe   :  { %v70_v16 = vadd.f32 1e-12, %v68_v15 }
 0x100   :  { %135 = vrsqrt.f32 %v70_v16  ;;  %vm78_vm2 = vweird.f32 %v70_v16 }
 0x103   :  { %v67_v17 = vpop.xlane.xlu1 %66 }
 0x104   :  { %v69_v18 = vmul.f32 0.03125, %v67_v17 }
 0x106   :  { %v136_v19 = vpop.eup %135  ;;  %v71_v20 = vadd.f32 1e-12, %v69_v18 }
 0x107   :  { %v73_v21 = vmul.f32 %v136_v19, %v70_v16  ;;  %vm79_vm1 = vweird.f32 %v136_v19 }
 0x108   :  { %137 = vrsqrt.f32 %v71_v20  ;;  %vm80_vm3 = vmor %vm78_vm2, %vm79_vm1  ;;  %vm88_vm5 = vweird.f32 %v71_v20 }
 0x109   :  { %v74_v22 = vmul.f32 %v136_v19, %v73_v21 }
 0x10b   :  { %v75_v23 = vmul.f32 0.5, %v74_v22 }
 0x10d   :  { %v76_v24 = vsub.f32 1.5, %v75_v23 }
 0x10e   :  { %v138_v25 = vpop.eup %137 }
 0x10f   :  { %v77_v26 = vmul.f32 %v136_v19, %v76_v24  ;;  %v83_v27 = vmul.f32 %v138_v25, %v71_v20  ;;  %vm89_vm4 = vweird.f32 %v138_v25 }
 0x110   :  { %vm90_vm6 = vmor %vm88_vm5, %vm89_vm4 }
 0x111   :  { %v81_v29 = vsel %vm80_vm3, %v136_v19, %v77_v26  ;;  %v84_v30 = vmul.f32 %v138_v25, %v83_v27 }
 0x112   :  { %v94_v31 = vmul.f32 %v81_v29, %v60_v7 }
 0x113   :  { %v85_v33 = vmul.f32 0.5, %v84_v30 }
 0x114   :  { %v99_v34 = vmul.f32 %v133_v28, %v94_v31 }
 0x115   :  { %v86_v35 = vsub.f32 1.5, %v85_v33 }
 0x116   :  { %v104_v36 = vadd.f32 %v134_v32, %v99_v34 }
 0x117   :  { %v87_v37 = vmul.f32 %v138_v25, %v86_v35 }
 0x118   :  { %106 = vst [vmem:[#allocation7] sm:$0xff] %v104_v36 }
 0x119   :  { %v91_v38 = vsel %vm90_vm6, %v138_v25, %v87_v37 }
 0x11a   :  { %v95_v39 = vmul.f32 %v91_v38, %v61_v12 }
 0x11c   :  { %v100_v40 = vmul.f32 %v133_v28, %v95_v39 }
 0x11e   :  { %v105_v41 = vadd.f32 %v134_v32, %v100_v40 }
 0x120   :  { %107 = vst [vmem:[#allocation7 + $0x8] sm:$0xff] %v105_v41 }
 0x121   :  { %120 = dma.vmem_to_hbm [thread:$0]  %s113_s25, 256, %s115_s28, [#allocation4], %s218_s20, %s218_s20, %s219_s21  }
 0x122   :  { %215 = dma.done.wait [#allocation4], 256  }
 0x123   :  { %216 = vsyncadd [#allocation4], 4294967040 }
 0x124   :  { %125 = vsyncpa [#allocation3], 1 }
 0x125   :  { %126 = vsyncpa [#allocation6], 1 }
 0x126   :  { %127 = vsyncpa [#allocation4], 1 }

</bundles_post_ra>
